<compile_context>
chip_gen: v6e
topology: v6e:2x2x1
jax: 0.10.0
libtpu: 0.0.40
codegen_flags: <defaults>
</compile_context>

<pallas_src>
import functools

import jax
import jax.numpy as jnp
from jax import lax
from jax.experimental import pallas as pl
from jax.experimental.pallas import tpu as pltpu


def _pick_row_block(batch: int) -> int:
    """Largest row-tile (<=256) that evenly divides the per-half batch."""
    for t in (256, 128, 64, 32, 16, 8):
        if batch % t == 0:
            return t
    return batch  # small / odd batch: single block per half


def _simclr_loss_kernel(zi_ref, zj_ref, loss_ref, zni_ref, znj_ref, *,
                        temperature: float, block_rows: int, batch: int):
    # zi_ref, zj_ref : (B, D) f32, fully resident in VMEM (constant index map).
    # loss_ref       : (1, 1) f32 in SMEM, resident across the whole grid.
    # zni_ref/znj_ref: (B, D) f32 VMEM scratch holding the normalized halves.
    h = pl.program_id(0)          # 0 -> rows come from z_i, 1 -> rows from z_j
    r = pl.program_id(1)          # row-block index inside the half
    B = batch
    N = 2 * B
    tm = block_rows
    inv_t = jnp.float32(1.0 / temperature)
    inv_n = jnp.float32(1.0 / N)

    # --- one-time setup (first grid step): normalize both halves, zero the
    # --- scalar accumulator.  Scratch + resident SMEM output persist.
    @pl.when((h == 0) & (r == 0))
    def _():
        zi = zi_ref[...]
        zj = zj_ref[...]
        # eps on the squared norm == torch's 1e-8 clamp on the norm.
        zni_ref[...] = zi * lax.rsqrt(
            jnp.maximum(jnp.sum(zi * zi, axis=-1, keepdims=True), 1e-16))
        znj_ref[...] = zj * lax.rsqrt(
            jnp.maximum(jnp.sum(zj * zj, axis=-1, keepdims=True), 1e-16))
        loss_ref[0, 0] = jnp.float32(0.0)

    # --- current row tile (tm rows of the conceptual concatenated matrix).
    ofs = pl.multiple_of(r * tm, tm)
    ni = zni_ref[pl.ds(ofs, tm), :]          # (tm, D) normalized z_i rows
    nj = znj_ref[pl.ds(ofs, tm), :]          # (tm, D) normalized z_j rows
    first_half = h == 0
    row = jnp.where(first_half, ni, nj) * inv_t   # queries, 1/T folded in once
    partner = jnp.where(first_half, nj, ni)       # positive-pair rows

    zni = zni_ref[...]                       # (B, D) key halves
    znj = znj_ref[...]

    # row @ zn.T on the MXU, f32 accumulation, no explicit transpose.
    dn = (((1,), (1,)), ((), ()))
    sim_l = lax.dot_general(row, zni, dn, preferred_element_type=jnp.float32)
    sim_r = lax.dot_general(row, znj, dn, preferred_element_type=jnp.float32)

    # --- exclude only the self-similarity (diagonal of the full N x N sim).
    col = lax.broadcasted_iota(jnp.int32, (tm, B), 1)
    krow = lax.broadcasted_iota(jnp.int32, (tm, B), 0) + ofs
    dmask = col == krow
    neg_big = jnp.float32(-1e30)
    sim_l = jnp.where(dmask & first_half, neg_big, sim_l)
    sim_r = jnp.where(dmask & (~first_half), neg_big, sim_r)

    # --- masked logsumexp over the full row (both halves).
    m = jnp.maximum(jnp.max(sim_l, axis=-1, keepdims=True),
                    jnp.max(sim_r, axis=-1, keepdims=True))
    s = (jnp.sum(jnp.exp(sim_l - m), axis=-1, keepdims=True)
         + jnp.sum(jnp.exp(sim_r - m), axis=-1, keepdims=True))
    lse = m + jnp.log(s)

    # --- positive logit: row-wise dot with the partner half (already / T).
    pos = jnp.sum(row * partner, axis=-1, keepdims=True)

    # CrossEntropy(reduction='sum') with label 0, divided by N, accumulated.
    loss_ref[0, 0] += jnp.sum(lse - pos) * inv_n


def simclr_loss(z_i: jax.Array, z_j: jax.Array, temperature: float) -> jax.Array:
    """Pallas SimCLR loss. z_i, z_j: [batch, n_dim]. Returns a scalar."""
    B, D = z_i.shape
    tm = _pick_row_block(B)
    rb = B // tm

    kernel = functools.partial(
        _simclr_loss_kernel,
        temperature=float(temperature),
        block_rows=tm,
        batch=B,
    )

    out = pl.pallas_call(
        kernel,
        out_shape=jax.ShapeDtypeStruct((1, 1), jnp.float32),
        grid=(2, rb),
        in_specs=[
            # Full arrays resident in VMEM; constant index map -> DMA'd once.
            pl.BlockSpec((B, D), lambda h, r: (0, 0)),
            pl.BlockSpec((B, D), lambda h, r: (0, 0)),
        ],
        out_specs=pl.BlockSpec((1, 1), lambda h, r: (0, 0),
                               memory_space=pltpu.SMEM),
        scratch_shapes=[
            pltpu.VMEM((B, D), jnp.float32),   # normalized z_i
            pltpu.VMEM((B, D), jnp.float32),   # normalized z_j
        ],
        compiler_params=pltpu.CompilerParams(
            # Sequential grid: scratch init + scalar accumulation across steps.
            dimension_semantics=("arbitrary", "arbitrary"),
            vmem_limit_bytes=64 * 1024 * 1024,
        ),
    )(z_i.astype(jnp.float32), z_j.astype(jnp.float32))
    return out[0, 0]


def _simclr_loss_ref(z_i, z_j, temperature):
    """Pure-JAX reference mirroring the PyTorch module."""
    B = z_i.shape[0]
    N = 2 * B
    z = jnp.concatenate([z_i, z_j], axis=0).astype(jnp.float32)
    zn = z / jnp.maximum(jnp.linalg.norm(z, axis=-1, keepdims=True), 1e-8)
    sim = (zn @ zn.T) / temperature
    pos = jnp.concatenate([jnp.diag(sim, k=B), jnp.diag(sim, k=-B)], axis=0)
    mask = jnp.ones((N, N), dtype=bool)
    mask = mask.at[jnp.arange(N), jnp.arange(N)].set(False)
    idx = jnp.arange(B)
    mask = mask.at[idx, idx + B].set(False)
    mask = mask.at[idx + B, idx].set(False)
    neg = sim[mask].reshape(N, -1)
    logits = jnp.concatenate([pos[:, None], neg], axis=1)
    lse = jax.nn.logsumexp(logits, axis=-1)
    return jnp.sum(lse - logits[:, 0]) / N


if __name__ == "__main__":
    batch_size = 8
    n_dim = 128
    temperature = 0.5

    key = jax.random.PRNGKey(0)
    k1, k2 = jax.random.split(key)
    z_i = jax.random.normal(k1, (batch_size, n_dim), dtype=jnp.float32)
    z_j = jax.random.normal(k2, (batch_size, n_dim), dtype=jnp.float32)

    loss = simclr_loss(z_i, z_j, temperature)
    jax.block_until_ready(loss)

    ref = _simclr_loss_ref(z_i, z_j, temperature)
    assert jnp.allclose(loss, ref, rtol=1e-4, atol=1e-4), (loss, ref)

    print("KERNEL_OK")
</pallas_src>

<mosaic_0001>
module attributes {stable_mosaic.version = 11 : i64} {
  func.func @_simclr_loss_kernel(%arg0: i32, %arg1: i32, %arg2: memref<8x128xf32, #tpu.memory_space<vmem>>, %arg3: memref<8x128xf32, #tpu.memory_space<vmem>>, %arg4: memref<1x1xf32, #tpu.memory_space<smem>>, %arg5: memref<8x128xf32, #tpu.memory_space<vmem>>, %arg6: memref<8x128xf32, #tpu.memory_space<vmem>>) attributes {dimension_semantics = [#tpu.dimension_semantics<arbitrary>, #tpu.dimension_semantics<arbitrary>], iteration_bounds = array<i64: 2, 1>, scalar_prefetch = 0 : i64, scratch_operands = 2 : i64, tpu.core_type = #tpu.core_type<tc>, window_params = [{pipeline_mode = #tpu.pipeline_mode<synchronous>, transform_indices = @transform_0, window_bounds = array<i64: 8, 128>}, {pipeline_mode = #tpu.pipeline_mode<synchronous>, transform_indices = @transform_1, window_bounds = array<i64: 8, 128>}, {transform_indices = @transform_2, window_bounds = array<i64: 1, 1>}]} {
    %c0_i32 = arith.constant 0 : i32
    %0 = arith.cmpi eq, %arg0, %c0_i32 : i32
    %c0_i32_0 = arith.constant 0 : i32
    %1 = arith.cmpi eq, %arg1, %c0_i32_0 : i32
    %2 = arith.andi %0, %1 : i1
    %3 = arith.extui %2 : i1 to i32
    %c0_i32_1 = arith.constant 0 : i32
    %4 = arith.cmpi ne, %3, %c0_i32_1 : i32
    scf.if %4 {
      %c0_23 = arith.constant 0 : index
      %c0_24 = arith.constant 0 : index
      %64 = vector.load %arg2[%c0_23, %c0_24] : memref<8x128xf32, #tpu.memory_space<vmem>>, vector<8x128xf32>
      %c0_25 = arith.constant 0 : index
      %c0_26 = arith.constant 0 : index
      %65 = vector.load %arg3[%c0_25, %c0_26] : memref<8x128xf32, #tpu.memory_space<vmem>>, vector<8x128xf32>
      %66 = arith.mulf %64, %64 : vector<8x128xf32>
      %cst_27 = arith.constant dense<0.000000e+00> : vector<8xf32>
      %67 = vector.multi_reduction <add>, %66, %cst_27 [1] : vector<8x128xf32> to vector<8xf32>
      %68 = vector.shape_cast %67 : vector<8xf32> to vector<8x1xf32>
      %cst_28 = arith.constant 1.000000e-16 : f32
      %69 = vector.broadcast %cst_28 : f32 to vector<8x1xf32>
      %70 = arith.maximumf %68, %69 : vector<8x1xf32>
      %71 = math.rsqrt %70 : vector<8x1xf32>
      %72 = vector.broadcast %71 : vector<8x1xf32> to vector<8x128xf32>
      %73 = arith.mulf %64, %72 : vector<8x128xf32>
      %c0_29 = arith.constant 0 : index
      %c0_30 = arith.constant 0 : index
      %74 = vector.load %arg5[%c0_29, %c0_30] : memref<8x128xf32, #tpu.memory_space<vmem>>, vector<8x128xf32>
      tpu.vector_store %arg5[%c0_29, %c0_30], %73 {strides = array<i32>} : memref<8x128xf32, #tpu.memory_space<vmem>>, vector<8x128xf32>,
      %75 = arith.mulf %65, %65 : vector<8x128xf32>
      %cst_31 = arith.constant dense<0.000000e+00> : vector<8xf32>
      %76 = vector.multi_reduction <add>, %75, %cst_31 [1] : vector<8x128xf32> to vector<8xf32>
      %77 = vector.shape_cast %76 : vector<8xf32> to vector<8x1xf32>
      %cst_32 = arith.constant 1.000000e-16 : f32
      %78 = vector.broadcast %cst_32 : f32 to vector<8x1xf32>
      %79 = arith.maximumf %77, %78 : vector<8x1xf32>
      %80 = math.rsqrt %79 : vector<8x1xf32>
      %81 = vector.broadcast %80 : vector<8x1xf32> to vector<8x128xf32>
      %82 = arith.mulf %65, %81 : vector<8x128xf32>
      %c0_33 = arith.constant 0 : index
      %c0_34 = arith.constant 0 : index
      %83 = vector.load %arg6[%c0_33, %c0_34] : memref<8x128xf32, #tpu.memory_space<vmem>>, vector<8x128xf32>
      tpu.vector_store %arg6[%c0_33, %c0_34], %82 {strides = array<i32>} : memref<8x128xf32, #tpu.memory_space<vmem>>, vector<8x128xf32>,
      %cst_35 = arith.constant 0.000000e+00 : f32
      %c0_36 = arith.constant 0 : index
      %c0_37 = arith.constant 0 : index
      %84 = memref.load %arg4[%c0_36, %c0_37] : memref<1x1xf32, #tpu.memory_space<smem>>
      memref.store %cst_35, %arg4[%c0_36, %c0_37] : memref<1x1xf32, #tpu.memory_space<smem>>
    } else {
    }
    %c8_i32 = arith.constant 8 : i32
    %5 = arith.muli %arg1, %c8_i32 : i32
    %6 = tpu.assume_multiple %5, 8 : i32
    %7 = arith.index_cast %6 : i32 to index
    %c0 = arith.constant 0 : index
    %8 = vector.load %arg5[%7, %c0] : memref<8x128xf32, #tpu.memory_space<vmem>>, vector<8x128xf32>
    %9 = arith.index_cast %6 : i32 to index
    %c0_2 = arith.constant 0 : index
    %10 = vector.load %arg6[%9, %c0_2] : memref<8x128xf32, #tpu.memory_space<vmem>>, vector<8x128xf32>
    %c0_i32_3 = arith.constant 0 : i32
    %11 = arith.cmpi eq, %arg0, %c0_i32_3 : i32
    %12 = arith.select %11, %8, %10 : vector<8x128xf32>
    %cst = arith.constant 2.000000e+00 : f32
    %13 = vector.broadcast %cst : f32 to vector<8x128xf32>
    %14 = arith.mulf %12, %13 : vector<8x128xf32>
    %15 = arith.select %11, %10, %8 : vector<8x128xf32>
    %c0_4 = arith.constant 0 : index
    %c0_5 = arith.constant 0 : index
    %16 = vector.load %arg5[%c0_4, %c0_5] : memref<8x128xf32, #tpu.memory_space<vmem>>, vector<8x128xf32>
    %c0_6 = arith.constant 0 : index
    %c0_7 = arith.constant 0 : index
    %17 = vector.load %arg6[%c0_6, %c0_7] : memref<8x128xf32, #tpu.memory_space<vmem>>, vector<8x128xf32>
    %cst_8 = arith.constant dense<0.000000e+00> : vector<8x8xf32>
    %18 = tpu.matmul %14, %16, %cst_8 {dimension_numbers = #tpu.dot_dimension_numbers<[1], [1], [0], [0], [0, 0, 1, 0], [], []>} : vector<8x128xf32>, vector<8x128xf32>, vector<8x8xf32> -> vector<8x8xf32>
    %cst_9 = arith.constant dense<0.000000e+00> : vector<8x8xf32>
    %19 = tpu.matmul %14, %17, %cst_9 {dimension_numbers = #tpu.dot_dimension_numbers<[1], [1], [0], [0], [0, 0, 1, 0], [], []>} : vector<8x128xf32>, vector<8x128xf32>, vector<8x8xf32> -> vector<8x8xf32>
    %20 = tpu.iota {dimensions = array<i32: 1>} : vector<8x8xi32>
    %21 = tpu.iota {dimensions = array<i32: 0>} : vector<8x8xi32>
    %22 = vector.broadcast %6 : i32 to vector<8x8xi32>
    %23 = arith.addi %21, %22 : vector<8x8xi32>
    %24 = arith.cmpi eq, %20, %23 : vector<8x8xi32>
    %25 = vector.broadcast %11 : i1 to vector<8x8xi1>
    %26 = arith.andi %24, %25 : vector<8x8xi1>
    %cst_10 = arith.constant -1.000000e+30 : f32
    %27 = vector.broadcast %cst_10 : f32 to vector<8x8xf32>
    %28 = arith.select %26, %27, %18 : vector<8x8xi1>, vector<8x8xf32>
    %true = arith.constant true
    %29 = arith.xori %11, %true : i1
    %30 = vector.broadcast %29 : i1 to vector<8x8xi1>
    %31 = arith.andi %24, %30 : vector<8x8xi1>
    %cst_11 = arith.constant -1.000000e+30 : f32
    %32 = vector.broadcast %cst_11 : f32 to vector<8x8xf32>
    %33 = arith.select %31, %32, %19 : vector<8x8xi1>, vector<8x8xf32>
    %cst_12 = arith.constant dense<0xFF800000> : vector<8xf32>
    %34 = vector.multi_reduction <maximumf>, %28, %cst_12 [1] : vector<8x8xf32> to vector<8xf32>
    %35 = vector.shape_cast %34 : vector<8xf32> to vector<8x1xf32>
    %cst_13 = arith.constant dense<0xFF800000> : vector<8xf32>
    %36 = vector.multi_reduction <maximumf>, %33, %cst_13 [1] : vector<8x8xf32> to vector<8xf32>
    %37 = vector.shape_cast %36 : vector<8xf32> to vector<8x1xf32>
    %38 = arith.maximumf %35, %37 : vector<8x1xf32>
    %39 = vector.broadcast %38 : vector<8x1xf32> to vector<8x8xf32>
    %40 = arith.subf %28, %39 : vector<8x8xf32>
    %41 = math.exp %40 : vector<8x8xf32>
    %cst_14 = arith.constant dense<0.000000e+00> : vector<8xf32>
    %42 = vector.multi_reduction <add>, %41, %cst_14 [1] : vector<8x8xf32> to vector<8xf32>
    %43 = vector.shape_cast %42 : vector<8xf32> to vector<8x1xf32>
    %44 = vector.broadcast %38 : vector<8x1xf32> to vector<8x8xf32>
    %45 = arith.subf %33, %44 : vector<8x8xf32>
    %46 = math.exp %45 : vector<8x8xf32>
    %cst_15 = arith.constant dense<0.000000e+00> : vector<8xf32>
    %47 = vector.multi_reduction <add>, %46, %cst_15 [1] : vector<8x8xf32> to vector<8xf32>
    %48 = vector.shape_cast %47 : vector<8xf32> to vector<8x1xf32>
    %49 = arith.addf %43, %48 : vector<8x1xf32>
    %50 = math.log %49 : vector<8x1xf32>
    %51 = arith.addf %38, %50 : vector<8x1xf32>
    %52 = arith.mulf %14, %15 : vector<8x128xf32>
    %cst_16 = arith.constant dense<0.000000e+00> : vector<8xf32>
    %53 = vector.multi_reduction <add>, %52, %cst_16 [1] : vector<8x128xf32> to vector<8xf32>
    %54 = vector.shape_cast %53 : vector<8xf32> to vector<8x1xf32>
    %c0_17 = arith.constant 0 : index
    %c0_18 = arith.constant 0 : index
    %55 = memref.load %arg4[%c0_17, %c0_18] : memref<1x1xf32, #tpu.memory_space<smem>>
    %56 = arith.subf %51, %54 : vector<8x1xf32>
    %57 = vector.shape_cast %56 : vector<8x1xf32> to vector<1x8x1xf32>
    %cst_19 = arith.constant dense<0.000000e+00> : vector<1xf32>
    %58 = vector.multi_reduction <add>, %57, %cst_19 [1, 2] : vector<1x8x1xf32> to vector<1xf32>
    %59 = vector.shape_cast %58 : vector<1xf32> to vector<1x1x1xf32>
    %60 = vector.extract %59[0, 0, 0] : f32 from vector<1x1x1xf32>
    %cst_20 = arith.constant 6.250000e-02 : f32
    %61 = arith.mulf %60, %cst_20 : f32
    %62 = arith.addf %55, %61 : f32
    %c0_21 = arith.constant 0 : index
    %c0_22 = arith.constant 0 : index
    %63 = memref.load %arg4[%c0_21, %c0_22] : memref<1x1xf32, #tpu.memory_space<smem>>
    memref.store %62, %arg4[%c0_21, %c0_22] : memref<1x1xf32, #tpu.memory_space<smem>>
    return
  }
  func.func @transform_0(%arg0: i32, %arg1: i32) -> (i32, i32) {
    %c0_i32 = arith.constant 0 : i32
    %c0_i32_0 = arith.constant 0 : i32
    %c0_i32_1 = arith.constant 0 : i32
    return %c0_i32, %c0_i32_0 : i32, i32
  }
  func.func @transform_1(%arg0: i32, %arg1: i32) -> (i32, i32) {
    %c0_i32 = arith.constant 0 : i32
    %c0_i32_0 = arith.constant 0 : i32
    %c0_i32_1 = arith.constant 0 : i32
    return %c0_i32, %c0_i32_0 : i32, i32
  }
  func.func @transform_2(%arg0: i32, %arg1: i32) -> (i32, i32) {
    %c0_i32 = arith.constant 0 : i32
    %c0_i32_0 = arith.constant 0 : i32
    %c0_i32_1 = arith.constant 0 : i32
    return %c0_i32, %c0_i32_0 : i32, i32
  }
}

</mosaic_0001>

<bundles_post_ra>
// kernel: tpu_custom_call.1
= control target key start
LH: loop header
LB: loop body
LE: loop exit
PB: predicated region body
PF: predicated region fallthrough
CT: control target
= control target key end

     0   :  { %7 = vsyncpa [#allocation5], 0  ;;  %s766_s0 = inlined_call_operand.hbm [shape: f32[8,128], index: 0, kind: input, shape index: {}]   ;;  %s767_s1 = inlined_call_operand.hbm [shape: f32[8,128], index: 1, kind: input, shape index: {}]   ;;  %s768_s2 = inlined_call_operand.hbm [shape: f32[1,1], index: 2, kind: output, shape index: {}]  }
   0x1   :  { %8 = vsyncpa [#allocation8], 0 }
   0x2   :  { %9 = vsyncpa [#allocation6], 0  ;;  %s665_s9 = smov 0   ;;  %s667_s10 = smov 0  }
   0x3   :  { %s669_s11 = smov 0  }
   0x4 LB: > { %s452_s12 = sadd.s32 4294967295, %s642_s11   ;;  %s27_s13 = sadd.s32 1, %s638_s10  ;;  %s642_s11 = sphi %s669_s11, %s15_s11   ;;  %s638_s10 = sphi %s667_s10, %s780_s10   ;;  %s634_s9 = sphi %s665_s9, %s779_s9  }
   0x5   : > { %p29_p0 = scmp.ge.s32.totalorder %s27_s13, 2  ;;  %p453_p1 = scmp.ge.s32.totalorder %s642_s11, 1 }
   0x6   : > { %p95_p2 = scmp.lt.s32.totalorder %s642_s11, 3  ;;  %p692_p4 = scmp.eq.s32.totalorder %s452_s12, 0 }
   0x7   : > { %s782_s13 = smov (%p29_p0, %s27_s13), 0  ;;  %s644_s16 = smov [#allocation4]  }
   0x8   : > { %p686_p3 = pnand %p453_p1, %p95_p2  ;;  %s108_s17 = sshll.u32 %s644_s16, 4  ;;  %s109_s17 = int_to_ptr.vmem [resolvable:$true] %s108_s17 }
   0x9   : > { %s773_s15 = scalar_select %p692_p4, 1, 0 }
   0xa   : > { %s772_s14 = scalar_select %p686_p3, 1, 0 }
   0xb   : > { %p493_p5 = pneg %p686_p3  ;;  %s645_s18 = smov [#allocation7]  }
   0xc   : > { %s119_s19 = sshll.u32 %s645_s18, 4  ;;  %s557_s21 = scalar_lea.vmem %s109_s17, 128  ;;  %s120_s19 = int_to_ptr.vmem [resolvable:$true] %s119_s19 }
   0xd   : > { %p700_p6 = pnand %p692_p4, %p493_p5  ;;  %p558_p8 = scmp.ne.s32.totalorder %s109_s17, %s557_s21 }
   0xe   : > { %p565_p11 = scmp.lt.s32.totalorder %s109_s17, %s109_s17  ;;  %p566_p12 = scmp.lt.s32.totalorder %s557_s21, %s557_s21 }
   0xf   : > { %p548_p7 = pneg %p700_p6 }
  0x10   : > { %p567_p13 = por %p566_p12, %p565_p11 }
  0x11   : > { %p560_p9 = pnand %p558_p8, %p548_p7 }
  0x13   : > { %p561_p10 = pneg %p560_p9 }
  0x15   : > { %p568_p0 = pnand %p567_p13, %p561_p10 }
  0x17   : > { %571 = shalt.err (!%p568_p0)
}
  0x18   : > { %496 = dma.hbm_to_vmem [thread:$0]  (!%p700_p6), %s766_s0, 128, %s109_s17, [#allocation5]  }
  0x19   : > { %s583_s24 = scalar_lea.vmem %s120_s19, 128  ;;  %p591_p8 = scmp.lt.s32.totalorder %s120_s19, %s120_s19 }
  0x1a   : > { %p584_p1 = scmp.ne.s32.totalorder %s120_s19, %s583_s24  ;;  %p592_p9 = scmp.lt.s32.totalorder %s583_s24, %s583_s24 }
  0x1c   : > { %p586_p2 = pnand %p584_p1, %p548_p7  ;;  %p593_p4 = por %p592_p9, %p591_p8 }
  0x1e   : > { %p587_p5 = pneg %p586_p2 }
  0x20   : > { %p594_p3 = pnand %p593_p4, %p587_p5 }
  0x22   : > { %597 = shalt.err (!%p594_p3)
}
  0x23   : > { %499 = dma.hbm_to_vmem [thread:$0]  (!%p700_p6), %s767_s1, 128, %s120_s19, [#allocation8]  }
  0x24   : > { %p775_p10 = scmp.ne.s32.totalorder %s772_s14, 0 }
  0x25   : > { %p776_p11 = scmp.ne.s32.totalorder (!%p775_p10), %s773_s15, 0 }
  0x26   : > { %132 = sbr.rel (%p775_p10) target bundleno = 953 (0x3b9), region = 28 }
  0x2b   : > { %621 = dma.done.wait (%p776_p11), [#allocation5], 128  }
  0x2c   : > { %623 = vsyncadd (%p776_p11), [#allocation5], 4294967168 }
  0x2d   : > { %625 = dma.done.wait (%p776_p11), [#allocation8], 128  }
  0x2e   : > { %627 = vsyncadd (%p776_p11), [#allocation8], 4294967168  ;;  %p148_p3 = scmp.eq.s32.totalorder %s634_s9, 0 }
  0x2f   : > { %v154_v0 = vld [vmem:[#allocation4] sm:$0xff] (%p148_p3)  ;;  %v155_v1 = vld [vmem:[#allocation7] sm:$0xff] (%p148_p3)  ;;  %s646_s27 = smov (%p148_p3), 0.0  }
  0x30   : > { %153 = sbr.rel (!%p148_p3) target bundleno = 211 (0xd3), region = 40  ;;  %v156_v2 = vmul.f32 (%p148_p3), %v154_v0, %v154_v0  ;;  %v163_v3 = vmul.f32 (%p148_p3), %v155_v1, %v155_v1  ;;  %171 = sst [smem:[#allocation9]] (%p148_p3), %s646_s27 }
  0x32   : > { %157 = vadd.xlane.f32.xlu0 (%p148_p3), %v156_v2 }
  0x36   : > { %164 = vadd.xlane.f32.xlu0 %v163_v3 }
  0xbb   : > { %v158_v4 = vpop.xlane.xlu0 %157 }
  0xbc   : > { %v159_v5 = vmax.f32 %v158_v4, 1e-16 }
  0xbe   : > { %536 = vrsqrt.f32 %v159_v5 }
  0xbf   : > { %v165_v6 = vpop.xlane.xlu0 %164 }
  0xc0   : > { %v166_v7 = vmax.f32 %v165_v6, 1e-16 }
  0xc2   : > { %538 = vrsqrt.f32 %v166_v7 }
  0xcb   : > { %v537_v8 = vpop.eup %536 }
  0xcc   : > { %v161_v9 = vmul.f32 %v537_v8, %v154_v0 }
  0xce   : > { %162 = vst [vmem:[#allocation2] sm:$0xff] %v161_v9 }
  0xcf   : > { %v539_v10 = vpop.eup %538 }
  0xd0   : > { %v168_v11 = vmul.f32 %v539_v10, %v155_v1 }
  0xd2   : > { %169 = vst [vmem:[#allocation3] sm:$0xff] %v168_v11 }
  0xd3 PF: > { %s177_s28 = scalar_select %p148_p3, 1, 0  ;;  %v647_v13 = vmov 0.0   ;;  %vm648_vm0 = vmmov 0   ;;  %v325_v19 = vlaneseq  ;;  %vm340_vm6 = vcmask 64512  }
  0xd4   : > { %469 = vmatprep.subr.mxu0 %v647_v13  ;;  %474 = vmatprep.subr.mxu1 %v647_v13  ;;  %p334_p4 = scmp.ne.s32.totalorder %s634_s9, 0  ;;  %vm369_vm7 = vcmask 7168   ;;  %s367_s30 = sld [smem:[#allocation9]] }
  0xd5   : > { %v183_v12 = vld [vmem:[#allocation2] sm:$0xff]  ;;  %471 = vmatprep.mubr.msk.f32.mxu0 %vm648_vm0, %v647_v13  ;;  %v178_v15 = vstv %s177_s28  ;;  %476 = vmatprep.mubr.msk.f32.mxu1 %vm648_vm0, %v647_v13  ;;  %v326_v20 = vand.u32 127, %v325_v19  ;;  %v328_v21 = vshrl.u32 %v325_v19, 7  ;;  %p504_p6 = scmp.eq.s32.totalorder %s452_s12, 1  ;;  %s649_s6 = smov [#allocation9]  }
  0xd6   : > { %470 = vmatpush3.xpose.msra.mxu0 %v183_v12  ;;  %vm737_vm1 = vcmp.eq.s32.totalorder %v178_v15, 1  ;;  %s335_s29 = scalar_select %p334_p4, 1, 0 }
  0xd7   : > { %vm331_vm2 = vcmp.eq.s32.totalorder %v326_v20, %v328_v21 }
  0xd8   : > { %v336_v22 = vstv %s335_s29  ;;  %vm332_vm4 = vmand %vm331_vm2, %vm737_vm1 }
  0xd9   : > { %v184_v14 = vld [vmem:[#allocation3] sm:$0xff]  ;;  %vm337_vm3 = vcmp.eq.s32.totalorder %v336_v22, 1 }
  0xda   : > { %475 = vmatpush3.xpose.msra.mxu1 %v184_v14  ;;  %v180_v17 = vsel %vm737_vm1, %v183_v12, %v184_v14  ;;  %vm338_vm5 = vmand %vm331_vm2, %vm337_vm3  ;;  %v182_v31 = vsel %vm737_vm1, %v184_v14, %v183_v12 }
  0xdb   : > { %v181_v18 = vmul.f32 2.0, %v180_v17 }
  0xdd   : > { %472 = vmatmul.mubr.f32.vlgmr.msra.gmra.mxu0 %v181_v18  ;;  %477 = vmatmul.mubr.f32.vlgmr.msra.gmra.mxu1 %v181_v18  ;;  %v364_v32 = vmul.f32 %v182_v31, %v181_v18 }
 0x19d   : > { %v251_v23 = vpop.f32.mrf.mxu0  ;;  %v321_v24 = vpop.f32.mrf.mxu1 }
 0x19e   : > { %v333_v25 = vsel %vm332_vm4, -1e+30, %v251_v23  ;;  %v339_v26 = vsel %vm338_vm5, -1e+30, %v321_v24 }
 0x19f   : > { %v473_v27 = vpop.f32.mrf.mxu0  ;;  %v341_v28 = vsel %vm340_vm6, %v333_v25, -inf  ;;  %v478_v29 = vpop.f32.mrf.mxu1  ;;  %v344_v30 = vsel %vm340_vm6, %v339_v26, -inf }
 0x1a0   : > { %342 = vmax.xlane.f32.xlu0 %v341_v28 }
 0x1a4   : > { %345 = vmax.xlane.f32.xlu0 %v344_v30 }
 0x1a8   : > { %365 = vadd.xlane.f32.xlu0 %v364_v32 }
 0x229   : > { %v343_v33 = vpop.xlane.xlu0 %342 }
 0x22d   : > { %v346_v34 = vpop.xlane.xlu0 %345 }
 0x22e   : > { %v347_v35 = vmax.f32 %v343_v33, %v346_v34 }
 0x230   : > { %v348_v36 = vsub.f32 %v333_v25, %v347_v35  ;;  %v354_v37 = vsub.f32 %v339_v26, %v347_v35 }
 0x231   : > { %v366_v49 = vpop.xlane.xlu0 %365 }
 0x232   : > { %v349_v38 = vmul.f32 1.442695, %v348_v36  ;;  %v355_v39 = vmul.f32 1.442695, %v354_v37 }
 0x234   : > { %540 = vpow2.f32 %v349_v38 }
 0x235   : > { %542 = vpow2.f32 %v355_v39 }
 0x241   : > { %v541_v40 = vpop.eup %540 }
 0x242   : > { %v351_v41 = vsel %vm340_vm6, %v541_v40, 0.0  ;;  %v543_v42 = vpop.eup %542 }
 0x243   : > { %352 = vadd.xlane.f32.xlu1 %v351_v41  ;;  %v357_v43 = vsel %vm340_vm6, %v543_v42, 0.0 }
 0x247   : > { %358 = vadd.xlane.f32.xlu1 %v357_v43 }
 0x2cc   : > { %v353_v44 = vpop.xlane.xlu1 %352 }
 0x2d0   : > { %v359_v45 = vpop.xlane.xlu1 %358 }
 0x2d1   : > { %v360_v46 = vadd.f32 %v359_v45, %v353_v44 }
 0x2d3   : > { %544 = vlog2.f32 %v360_v46 }
 0x2e0   : > { %v545_v47 = vpop.eup %544 }
 0x2e1   : > { %v362_v48 = vmul.f32 0.6931472, %v545_v47 }
 0x2e3   : > { %v363_v50 = vadd.f32 %v362_v48, %v347_v35 }
 0x2e5   : > { %v368_v51 = vsub.f32 %v363_v50, %v366_v49 }
 0x2e7   : > { %v370_v52 = vsel %vm369_vm7, %v368_v51, 0.0 }
 0x2e8   : > { %371 = vadd.xlane.f32.xlu1 %v370_v52 }
 0x371   : > { %v372_v53 = vpop.xlane.xlu1 %371 }
 0x372   : > { %v373_v54 = vrot.slane %v372_v53, 4 }
 0x374   : > { %v374_v55 = vadd.f32 %v373_v54, %v372_v53 }
 0x376   : > { %v375_v56 = vrot.slane %v374_v55, 2 }
 0x378   : > { %v376_v57 = vadd.f32 %v375_v56, %v374_v55 }
 0x37a   : > { %v377_v58 = vrot.slane %v376_v57, 1 }
 0x37c   : > { %v378_v59 = vadd.f32 %v377_v58, %v376_v57 }
 0x37e   : > { %479 = vpush %v378_v59 }
 0x3af   : > { %s480_s3 = spop %479 }
 0x3b0   : > { %s380_s4 = smul.f32 0.0625, %s480_s3 }
 0x3b2   : > { %s381_s5 = sadd.f32 %s380_s4, %s367_s30 }
 0x3b4   : > { %383 = sst [smem:[#allocation9]] %s381_s5 }
 0x3b5   : > { %490 = dma.smem_to_hbm (%p504_p6), %s649_s6, 16, %s768_s2, [#allocation6]  }
 0x3b6   : > { %629 = dma.done.wait (%p504_p6), [#allocation6], 16  }
 0x3b7   : > { %631 = vsyncadd (%p504_p6), [#allocation6], 4294967280 }
 0x3b8   : > { %397 = sfence }
 0x3b9 PF: > { %s15_s11 = sadd.s32 1, %s642_s11   ;;  %s779_s9 = smov %s638_s10 }
 0x3ba   : > { %p12_p7 = scmp.ge.s32.totalorder %s15_s11, 4   ;;  %s780_s10 = smov %s782_s13 }
 0x3bc   :  { %14 = sbr.rel (!%p12_p7) target bundleno = 4 (0x4), region = 69 }
 0x3c1   :  { %403 = vsyncpa [#allocation5], 1 }
 0x3c2   :  { %405 = vsyncpa [#allocation5 + $0x1], 1 }
 0x3c3   :  { %406 = vsyncpa [#allocation8], 1 }
 0x3c4   :  { %407 = vsyncpa [#allocation6], 1 }
 0x3c5   :  { %409 = vsyncpa [#allocation6 + $0x1], 1 }

</bundles_post_ra>
